<compile_context>
chip_gen: v7x
topology: tpu7x:2x2x1
jax: 0.10.0
libtpu: 0.0.40
codegen_flags: <defaults>
</compile_context>

<pallas_src>
import functools

import numpy as np
import jax
import jax.numpy as jnp
from jax.experimental import pallas as pl
from jax.experimental.pallas import tpu as pltpu


# ----------------------------------------------------------------------------
# Tiling constants / helpers
# ----------------------------------------------------------------------------
_LANE = 128
_SUBLANE = 8
_TILE_MAX = 2048              # >=512 rows already ~85% of HBM roofline


def _cdiv(a, b):
    return -(-a // b)


def _round_up(a, m):
    return _cdiv(a, m) * m


@functools.lru_cache(maxsize=1)
def _vmem_limit_bytes():
    """Per-generation scoped-VMEM limit (v5e/v6e: 128 MiB, v7x: 64 MiB)."""
    cap = 64 * 2**20
    try:
        cap = int(pltpu.get_tpu_info().vmem_capacity_bytes)
    except Exception:
        pass
    return max(int(cap * 0.75), 32 * 2**20)   # headroom for compiler scratch


@functools.lru_cache(maxsize=1)
def _buffered_weights_supported():
    """Probe pipeline_mode=pl.Buffered(1) (single-buffered constant blocks)."""
    try:
        def k(x_ref, w_ref, o_ref):
            o_ref[...] = x_ref[...] + w_ref[...]

        x = jnp.zeros((16, 128), jnp.float32)
        w = jnp.zeros((8, 128), jnp.float32)
        out = pl.pallas_call(
            k,
            out_shape=jax.ShapeDtypeStruct((16, 128), jnp.float32),
            grid=(2,),
            in_specs=[
                pl.BlockSpec((8, 128), lambda i: (i, 0)),
                pl.BlockSpec((8, 128), lambda i: (0, 0),
                             pipeline_mode=pl.Buffered(1)),
            ],
            out_specs=pl.BlockSpec((8, 128), lambda i: (i, 0)),
        )(x, w)
        jax.block_until_ready(out)
        return True
    except Exception:
        return False


def _const_block_spec(shape, buffered_ok):
    index_map = lambda i: (0,) * len(shape)
    if buffered_ok:
        # Constant index_map: double-buffering would be pure VMEM waste (v7x).
        return pl.BlockSpec(shape, index_map, pipeline_mode=pl.Buffered(1))
    return pl.BlockSpec(shape, index_map)


def _choose_row_tile(n_rows, d_in, widths, w_bytes, budget):
    """Largest row tile that fits the VMEM budget, counting f32 accumulators."""
    d_out = widths[-1]
    max_w = max(widths)
    per_row = (
        2 * d_in * 2        # bf16 x tile, double-buffered
        + 2 * d_out * 4     # f32 output tile, double-buffered
        + max_w * 2         # live bf16 activation
        + max_w * 4         # live f32 MXU accumulator
    )
    avail = max(budget - w_bytes, per_row * _SUBLANE)
    tn = min(_TILE_MAX, (avail // per_row) // _SUBLANE * _SUBLANE)
    tn = max(tn, _SUBLANE)
    # Aim for >=4 grid steps so v7x megacore gets >=2 pipelined steps per core.
    tn = min(tn, _round_up(_cdiv(n_rows, 4), _SUBLANE))
    tn = max(tn, _SUBLANE)
    if tn >= n_rows:
        tn = n_rows         # one full-extent block (valid for any n_rows)
    return tn


# ----------------------------------------------------------------------------
# Pallas kernel: hidden MLP stack (Linear -> ReLU, Dropout==identity in eval)
# ----------------------------------------------------------------------------
def _make_hidden_mlp_kernel(n_hidden):
    def kernel(*refs):
        x_ref = refs[0]
        o_ref = refs[-1]
        wb = refs[1:-1]                     # interleaved (W0, b0, W1, b1, ...)
        h = x_ref[...]                      # bf16 rows
        for li in range(n_hidden):
            w = wb[2 * li][...]             # bf16 weights
            b = wb[2 * li + 1][...]         # f32 (1, d) bias
            acc = jnp.dot(h, w, preferred_element_type=jnp.float32)   # MXU
            acc = jnp.maximum(acc + b, 0.0)  # bias + ReLU in f32 (v5e: no bf16 VPU)
            h = acc if li == n_hidden - 1 else acc.astype(jnp.bfloat16)
        o_ref[...] = h                       # lane-dense f32 last-hidden tile

    return kernel


def _hidden_mlp_pallas(x_bf16, weights, biases):
    """ReLU-MLP hidden stack for one species decoder in a single Pallas kernel.

    x_bf16  : (n, d_in)      bfloat16 (only the consumed / deduped rows)
    weights : tuple of (d_i_pad, d_{i+1}_pad) bfloat16, widths padded to 128
    biases  : tuple of (1, d_{i+1}_pad)       float32
    returns : (n, d_last_pad) float32  -- last hidden activations
    """
    n, d_in = x_bf16.shape
    n_hidden = len(weights)
    if n_hidden == 0:
        return x_bf16.astype(jnp.float32)
    widths = [int(w.shape[1]) for w in weights]
    d_out = widths[-1]

    buffered_ok = _buffered_weights_supported()
    w_factor = 1 if buffered_ok else 2
    w_bytes = w_factor * sum(
        int(np.prod(w.shape)) * 2 + int(np.prod(b.shape)) * 4
        for w, b in zip(weights, biases))

    limit = _vmem_limit_bytes()
    tn = _choose_row_tile(n, d_in, widths, w_bytes, int(limit * 0.75))

    in_specs = [pl.BlockSpec((tn, d_in), lambda i: (i, 0))]
    args = [x_bf16]
    for w, b in zip(weights, biases):
        in_specs.append(_const_block_spec(w.shape, buffered_ok))
        in_specs.append(_const_block_spec(b.shape, buffered_ok))
        args.append(w)
        args.append(b)

    return pl.pallas_call(
        _make_hidden_mlp_kernel(n_hidden),
        out_shape=jax.ShapeDtypeStruct((n, d_out), jnp.float32),
        grid=(pl.cdiv(n, tn),),              # ragged tail handled by Pallas
        in_specs=in_specs,
        out_specs=pl.BlockSpec((tn, d_out), lambda i: (i, 0)),
        compiler_params=pltpu.CompilerParams(
            dimension_semantics=("parallel",),
            vmem_limit_bytes=limit,
        ),
    )(*args)


# ----------------------------------------------------------------------------
# Per-species forward (jitted; shared across species with identical shapes)
# ----------------------------------------------------------------------------
@jax.jit
def _species_forward(z, global_latent, b_idx, g_idx,
                     kernel_ws, kernel_bs, w_last_t, b_last):
    """softplus(decoder(cat[z, global[b_idx]]))[b_idx, g_idx] for one species."""
    n_cells = global_latent.shape[0]
    n_entries = z.shape[0]
    # Row dedup: decoded is only ever gathered at row indices b_idx[e] < n_cells,
    # so the MLP only needs rows [0, min(n_cells, n_entries)) of combined_z
    # (combined_z[r] = [z[r], global_latent[b_idx[r]]], matching torch).
    rows = min(n_cells, n_entries)
    x = jnp.concatenate([z[:rows], global_latent[b_idx[:rows]]],
                        axis=1).astype(jnp.bfloat16)

    # Hidden MLP stack on TPU (Pallas).  (rows, h_pad) f32.
    h = _hidden_mlp_pallas(x, kernel_ws, kernel_bs)

    # Final layer only at the (row, gene) pairs actually consumed:
    #   decoded[b_idx[e], g_idx[e]] = h[b_idx[e]] . W_last[:, g_idx[e]] + b_last[g_idx[e]]
    h_rows = h[b_idx]                                   # (N, h_pad) f32
    w_cols = w_last_t[g_idx].astype(jnp.float32)        # (N, h_pad) from cached bf16
    logits = jnp.sum(h_rows * w_cols, axis=1) + b_last[g_idx]

    # Numerically stable Softplus.
    return jnp.maximum(logits, 0.0) + jnp.log1p(jnp.exp(-jnp.abs(logits)))


# ----------------------------------------------------------------------------
# Parameter preparation (cached; runs once per model, not per forward call)
# ----------------------------------------------------------------------------
def _prepare_species_params(weights, biases):
    """Split a decoder stack into (padded bf16 hidden layers, final layer).

    Every hidden width is zero-padded to a multiple of 128 lanes (zero bias
    pads + zero downstream weight rows keep numerics exact); the final weight
    is stored pre-transposed as (n_genes, h_pad) bf16 for the per-entry gather.
    """
    n_hidden = len(weights) - 1
    ws, bs = [], []
    prev_pad_width = int(jnp.asarray(weights[0]).shape[0])   # d_in: not K-padded
    for li in range(n_hidden):
        w = jnp.asarray(weights[li], dtype=jnp.float32)
        b = jnp.asarray(biases[li], dtype=jnp.float32).reshape(1, -1)
        d_out = w.shape[1]
        d_out_pad = _round_up(d_out, _LANE)
        w = jnp.pad(w, ((0, prev_pad_width - w.shape[0]), (0, d_out_pad - d_out)))
        b = jnp.pad(b, ((0, 0), (0, d_out_pad - d_out)))
        ws.append(w.astype(jnp.bfloat16))
        bs.append(b)
        prev_pad_width = d_out_pad
    w_last = jnp.asarray(weights[-1], dtype=jnp.float32)      # (h_last, n_genes)
    b_last = jnp.asarray(biases[-1], dtype=jnp.float32).reshape(-1)
    h_last = w_last.shape[0]
    w_last_t = jnp.pad(w_last.T, ((0, 0), (0, prev_pad_width - h_last)))
    return tuple(ws), tuple(bs), w_last_t.astype(jnp.bfloat16), b_last


def prepare_decoder_params(params):
    return [_prepare_species_params(p["W"], p["b"]) for p in params]


_PREP_CACHE = {}


# ----------------------------------------------------------------------------
# Decoder.forward
# ----------------------------------------------------------------------------
def decoder_forward(params, species_latents, global_latent,
                    batch_idx, gene_idx, species_idx, values,
                    prepared_params=None):
    """Mirrors Decoder.forward.

    params           : list (per species) of {'W': [...], 'b': [...]}
    species_latents  : dict species_id -> latent array (N_i, n_latent)
    global_latent    : (n_cells, n_latent)
    batch_idx/gene_idx/species_idx/values : (n_entries,) sparse expression data
    """
    if prepared_params is None:
        key = id(params)
        prepared_params = _PREP_CACHE.get(key)
        if prepared_params is None:
            prepared_params = prepare_decoder_params(params)
            _PREP_CACHE[key] = prepared_params

    # Prime host-side hardware probes outside of jit tracing.
    _vmem_limit_bytes()
    _buffered_weights_supported()

    n_species = len(params)
    output = jnp.zeros_like(values)
    species_idx_np = np.asarray(species_idx)

    for i in range(n_species):
        if i not in species_latents:
            continue
        # species_mask -> entry indices (host-side glue; boolean indexing is
        # not static-shape friendly inside jit).
        entry_ids = np.nonzero(species_idx_np == i)[0]
        if entry_ids.size == 0:
            continue

        z = species_latents[i]                        # (N_i, n_latent)
        eid = jnp.asarray(entry_ids)
        b_idx = batch_idx[eid]                        # batch_species_idx
        g_idx = gene_idx[eid]                         # gene_species_idx

        ws, bs, w_last_t, b_last = prepared_params[i]
        species_out = _species_forward(z, global_latent, b_idx, g_idx,
                                       ws, bs, w_last_t, b_last)

        # output[species_mask] = species_output
        output = output.at[eid].set(species_out.astype(output.dtype))

    return output


# Pure-JAX f32 reference of one species decoder (sanity check only).
def _mlp_softplus_ref(x, weights, biases):
    h = x
    for li, (w, b) in enumerate(zip(weights, biases)):
        h = h @ w + b
        if li < len(weights) - 1:
            h = jnp.maximum(h, 0.0)
    return jnp.maximum(h, 0.0) + jnp.log1p(jnp.exp(-jnp.abs(h)))


# ----------------------------------------------------------------------------
# Demo
# ----------------------------------------------------------------------------
if __name__ == "__main__":
    key = jax.random.PRNGKey(0)
    keys = jax.random.split(key, 8)

    n_genes, n_species, n_latent = 16, 2, 8
    hidden_dims = [32, 32]
    n_cells = 4
    entries_per_species = 24
    n_entries = entries_per_species * n_species

    # Sparse expression data (SparseExpressionData)
    batch_idx = jax.random.randint(keys[0], (n_entries,), 0, n_cells)
    gene_idx = jax.random.randint(keys[1], (n_entries,), 0, n_genes)
    species_idx = jnp.repeat(jnp.arange(n_species, dtype=jnp.int32),
                             entries_per_species)
    values = jax.random.uniform(keys[2], (n_entries,), dtype=jnp.float32)

    # EncoderOutput: global latent per batch + per-species latents
    global_latent = jax.random.normal(keys[3], (n_cells, n_latent),
                                      dtype=jnp.float32)
    species_latents = {
        i: jax.random.normal(jax.random.fold_in(keys[4], i),
                             (entries_per_species, n_latent),
                             dtype=jnp.float32)
        for i in range(n_species)
    }

    # Deterministic parameter init (PyTorch Linear default: U(+-1/sqrt(fan_in)))
    dims = [n_latent * 2] + list(hidden_dims) + [n_genes]
    params = []
    for s in range(n_species):
        Ws, bs = [], []
        for li in range(len(dims) - 1):
            kk = jax.random.fold_in(keys[5], s * 100 + li)
            kw, kb = jax.random.split(kk)
            bound = 1.0 / np.sqrt(dims[li])
            Ws.append(jax.random.uniform(kw, (dims[li], dims[li + 1]),
                                         minval=-bound, maxval=bound,
                                         dtype=jnp.float32))
            bs.append(jax.random.uniform(kb, (1, dims[li + 1]),
                                         minval=-bound, maxval=bound,
                                         dtype=jnp.float32))
        params.append({"W": Ws, "b": bs})

    prepared = prepare_decoder_params(params)           # once per model
    out = decoder_forward(params, species_latents, global_latent,
                          batch_idx, gene_idx, species_idx, values,
                          prepared_params=prepared)
    jax.block_until_ready(out)

    # Sanity check against a pure-JAX f32 reference of the same forward pass.
    # (Kernel uses bf16 inputs/weights with f32 accumulation -> looser tol.)
    ref_out = jnp.zeros_like(values)
    sp_np = np.asarray(species_idx)
    for i in range(n_species):
        eid = np.nonzero(sp_np == i)[0]
        b_i, g_i = batch_idx[eid], gene_idx[eid]
        comb = jnp.concatenate([species_latents[i], global_latent[b_i]], axis=1)
        dec = _mlp_softplus_ref(comb, params[i]["W"], params[i]["b"])
        ref_out = ref_out.at[jnp.asarray(eid)].set(dec[b_i, g_i])
    np.testing.assert_allclose(np.asarray(out), np.asarray(ref_out),
                               rtol=2e-2, atol=2e-2)

    print("KERNEL_OK")
</pallas_src>

<mosaic_0001>
module attributes {stable_mosaic.version = 11 : i64} {
  func.func @k(%arg0: i32, %arg1: memref<8x128xf32, #tpu.memory_space<vmem>>, %arg2: memref<8x128xf32, #tpu.memory_space<vmem>>, %arg3: memref<8x128xf32, #tpu.memory_space<vmem>>) attributes {dimension_semantics = [#tpu.dimension_semantics<arbitrary>], iteration_bounds = array<i64: 2>, scalar_prefetch = 0 : i64, scratch_operands = 0 : i64, tpu.core_type = #tpu.core_type<tc>, window_params = [{transform_indices = @transform_0, window_bounds = array<i64: 8, 128>}, {pipeline_mode = #tpu.pipeline_mode<synchronous>, transform_indices = @transform_1, window_bounds = array<i64: 8, 128>}, {transform_indices = @transform_2, window_bounds = array<i64: 8, 128>}]} {
    %c0 = arith.constant 0 : index
    %c0_0 = arith.constant 0 : index
    %0 = vector.load %arg1[%c0, %c0_0] : memref<8x128xf32, #tpu.memory_space<vmem>>, vector<8x128xf32>
    %c0_1 = arith.constant 0 : index
    %c0_2 = arith.constant 0 : index
    %1 = vector.load %arg2[%c0_1, %c0_2] : memref<8x128xf32, #tpu.memory_space<vmem>>, vector<8x128xf32>
    %2 = arith.addf %0, %1 : vector<8x128xf32>
    %c0_3 = arith.constant 0 : index
    %c0_4 = arith.constant 0 : index
    %3 = vector.load %arg3[%c0_3, %c0_4] : memref<8x128xf32, #tpu.memory_space<vmem>>, vector<8x128xf32>
    tpu.vector_store %arg3[%c0_3, %c0_4], %2 {strides = array<i32>} : memref<8x128xf32, #tpu.memory_space<vmem>>, vector<8x128xf32>,
    return
  }
  func.func @transform_0(%arg0: i32) -> (i32, i32) {
    %c0_i32 = arith.constant 0 : i32
    %c0_i32_0 = arith.constant 0 : i32
    return %arg0, %c0_i32 : i32, i32
  }
  func.func @transform_1(%arg0: i32) -> (i32, i32) {
    %c0_i32 = arith.constant 0 : i32
    %c0_i32_0 = arith.constant 0 : i32
    %c0_i32_1 = arith.constant 0 : i32
    return %c0_i32, %c0_i32_0 : i32, i32
  }
  func.func @transform_2(%arg0: i32) -> (i32, i32) {
    %c0_i32 = arith.constant 0 : i32
    %c0_i32_0 = arith.constant 0 : i32
    return %arg0, %c0_i32 : i32, i32
  }
}

module attributes {stable_mosaic.version = 11 : i64} {
  func.func @kernel(%arg0: i32, %arg1: memref<4x16xbf16, #tpu.memory_space<vmem>>, %arg2: memref<16x128xbf16, #tpu.memory_space<vmem>>, %arg3: memref<1x128xf32, #tpu.memory_space<vmem>>, %arg4: memref<128x128xbf16, #tpu.memory_space<vmem>>, %arg5: memref<1x128xf32, #tpu.memory_space<vmem>>, %arg6: memref<4x128xf32, #tpu.memory_space<vmem>>) attributes {dimension_semantics = [#tpu.dimension_semantics<parallel>], iteration_bounds = array<i64: 1>, scalar_prefetch = 0 : i64, scratch_operands = 0 : i64, tpu.core_type = #tpu.core_type<tc>, window_params = [{transform_indices = @transform_0, window_bounds = array<i64: 4, 16>}, {pipeline_mode = #tpu.pipeline_mode<synchronous>, transform_indices = @transform_1, window_bounds = array<i64: 16, 128>}, {pipeline_mode = #tpu.pipeline_mode<synchronous>, transform_indices = @transform_2, window_bounds = array<i64: 1, 128>}, {pipeline_mode = #tpu.pipeline_mode<synchronous>, transform_indices = @transform_3, window_bounds = array<i64: 128, 128>}, {pipeline_mode = #tpu.pipeline_mode<synchronous>, transform_indices = @transform_4, window_bounds = array<i64: 1, 128>}, {transform_indices = @transform_5, window_bounds = array<i64: 4, 128>}]} {
    %c0 = arith.constant 0 : index
    %c0_0 = arith.constant 0 : index
    %0 = vector.load %arg1[%c0, %c0_0] : memref<4x16xbf16, #tpu.memory_space<vmem>>, vector<4x16xbf16>
    %c0_1 = arith.constant 0 : index
    %c0_2 = arith.constant 0 : index
    %1 = vector.load %arg2[%c0_1, %c0_2] : memref<16x128xbf16, #tpu.memory_space<vmem>>, vector<16x128xbf16>
    %c0_3 = arith.constant 0 : index
    %c0_4 = arith.constant 0 : index
    %2 = vector.load %arg3[%c0_3, %c0_4] : memref<1x128xf32, #tpu.memory_space<vmem>>, vector<1x128xf32>
    %cst = arith.constant dense<0.000000e+00> : vector<4x128xf32>
    %3 = tpu.matmul %0, %1, %cst {dimension_numbers = #tpu.dot_dimension_numbers<[1], [0], [0], [1], [0, 0, 1, 1], [], []>} : vector<4x16xbf16>, vector<16x128xbf16>, vector<4x128xf32> -> vector<4x128xf32>
    %4 = vector.broadcast %2 : vector<1x128xf32> to vector<4x128xf32>
    %5 = arith.addf %3, %4 : vector<4x128xf32>
    %cst_5 = arith.constant 0.000000e+00 : f32
    %6 = vector.broadcast %cst_5 : f32 to vector<4x128xf32>
    %7 = arith.maximumf %5, %6 : vector<4x128xf32>
    %8 = arith.truncf %7 : vector<4x128xf32> to vector<4x128xbf16>
    %c0_6 = arith.constant 0 : index
    %c0_7 = arith.constant 0 : index
    %9 = vector.load %arg4[%c0_6, %c0_7] : memref<128x128xbf16, #tpu.memory_space<vmem>>, vector<128x128xbf16>
    %c0_8 = arith.constant 0 : index
    %c0_9 = arith.constant 0 : index
    %10 = vector.load %arg5[%c0_8, %c0_9] : memref<1x128xf32, #tpu.memory_space<vmem>>, vector<1x128xf32>
    %cst_10 = arith.constant dense<0.000000e+00> : vector<4x128xf32>
    %11 = tpu.matmul %8, %9, %cst_10 {dimension_numbers = #tpu.dot_dimension_numbers<[1], [0], [0], [1], [0, 0, 1, 1], [], []>} : vector<4x128xbf16>, vector<128x128xbf16>, vector<4x128xf32> -> vector<4x128xf32>
    %12 = vector.broadcast %10 : vector<1x128xf32> to vector<4x128xf32>
    %13 = arith.addf %11, %12 : vector<4x128xf32>
    %cst_11 = arith.constant 0.000000e+00 : f32
    %14 = vector.broadcast %cst_11 : f32 to vector<4x128xf32>
    %15 = arith.maximumf %13, %14 : vector<4x128xf32>
    %c0_12 = arith.constant 0 : index
    %c0_13 = arith.constant 0 : index
    %16 = vector.load %arg6[%c0_12, %c0_13] : memref<4x128xf32, #tpu.memory_space<vmem>>, vector<4x128xf32>
    tpu.vector_store %arg6[%c0_12, %c0_13], %15 {strides = array<i32>} : memref<4x128xf32, #tpu.memory_space<vmem>>, vector<4x128xf32>,
    return
  }
  func.func @transform_0(%arg0: i32) -> (i32, i32) {
    %c0_i32 = arith.constant 0 : i32
    %c0_i32_0 = arith.constant 0 : i32
    return %arg0, %c0_i32 : i32, i32
  }
  func.func @transform_1(%arg0: i32) -> (i32, i32) {
    %c0_i32 = arith.constant 0 : i32
    %c0_i32_0 = arith.constant 0 : i32
    %c0_i32_1 = arith.constant 0 : i32
    return %c0_i32, %c0_i32_0 : i32, i32
  }
  func.func @transform_2(%arg0: i32) -> (i32, i32) {
    %c0_i32 = arith.constant 0 : i32
    %c0_i32_0 = arith.constant 0 : i32
    %c0_i32_1 = arith.constant 0 : i32
    return %c0_i32, %c0_i32_0 : i32, i32
  }
  func.func @transform_3(%arg0: i32) -> (i32, i32) {
    %c0_i32 = arith.constant 0 : i32
    %c0_i32_0 = arith.constant 0 : i32
    %c0_i32_1 = arith.constant 0 : i32
    return %c0_i32, %c0_i32_0 : i32, i32
  }
  func.func @transform_4(%arg0: i32) -> (i32, i32) {
    %c0_i32 = arith.constant 0 : i32
    %c0_i32_0 = arith.constant 0 : i32
    %c0_i32_1 = arith.constant 0 : i32
    return %c0_i32, %c0_i32_0 : i32, i32
  }
  func.func @transform_5(%arg0: i32) -> (i32, i32) {
    %c0_i32 = arith.constant 0 : i32
    %c0_i32_0 = arith.constant 0 : i32
    return %arg0, %c0_i32 : i32, i32
  }
}

</mosaic_0001>

<bundles_post_ra>
// kernel: tpu_custom_call.1
= control target key start
LH: loop header
LB: loop body
LE: loop exit
PB: predicated region body
PF: predicated region fallthrough
CT: control target
= control target key end

     0   :  { %7 = vsyncpa [#allocation3], 0  ;;  %s690_s0 = inlined_call_operand.hbm [shape: f32[16,128], index: 0, kind: input, shape index: {}]   ;;  %s691_s1 = inlined_call_operand.hbm [shape: f32[8,128], index: 1, kind: input, shape index: {}]   ;;  %s692_s2 = inlined_call_operand.hbm [shape: f32[16,128], index: 2, kind: output, shape index: {}]  }
   0x1   :  { %9 = vsyncpa [#allocation3 + $0x1], 0 }
   0x2   :  { %10 = vsyncpa [#allocation6], 0 }
   0x3   :  { %11 = vsyncpa [#allocation4], 0 }
   0x4   :  { %13 = vsyncpa [#allocation4 + $0x1], 0  ;;  %s489_s9 = smov 0   ;;  %s491_s10 = smov 0  }
   0x5   :  { %s493_s11 = smov 0   ;;  %s495_s12 = smov 0  }
   0x6 LB: > { %s510_s13 = sadd.s32 4294967295, %s469_s12   ;;  %s270_s14 = sadd.s32 4294967294, %s469_s12   ;;  %s469_s12 = sphi %s495_s12, %s716_s12   ;;  %s465_s11 = sphi %s493_s11, %s715_s11   ;;  %s461_s10 = sphi %s491_s10, %s714_s10   ;;  %s457_s9 = sphi %s489_s9, %s713_s9  }
   0x7   : > { %p39_p0 = scmp.ne.s32.totalorder %s461_s10, %s457_s9  ;;  %p693_p1 = scmp.eq.s32.totalorder %s510_s13, 0 }
   0x8   : > { %p90_p3 = scmp.eq.s32.totalorder %s270_s14, 1  ;;  %p271_p5 = scmp.ge.s32.totalorder %s469_s12, 1 }
   0x9   : > { %p519_p4 = por %p693_p1, %p39_p0  ;;  %p97_p7 = scmp.lt.s32.totalorder %s469_s12, 3 }
   0xa   : > { %p524_p6 = por %p90_p3, %p39_p0  ;;  %s471_s18 = smov [#allocation5]  }
   0xb   : > { %s696_s15 = scalar_select %p519_p4, 1, 0 }
   0xc   : > { %s697_s16 = scalar_select %p524_p6, 1, 0 }
   0xd   : > { %p529_p8 = pnand %p271_p5, %p97_p7  ;;  %s110_s19 = sshll.u32 %s471_s18, 4  ;;  %s111_s19 = int_to_ptr.vmem [resolvable:$true] %s110_s19 }
   0xe   : > { %s537_s20 = sadd.s32 1, %s469_s12   ;;  %s26_s24 = sadd.s32 1, %s465_s11 }
   0xf   : > { %s698_s17 = scalar_select %p529_p8, 1, 0 }
  0x10   : > { %p292_p10 = pneg %p529_p8  ;;  %s23_s22 = ssub.s32 %s469_s12, %s537_s20 }
  0x11   : > { %p547_p12 = scmp.eq.s32.totalorder %s23_s22, 0  ;;  %s341_s27 = scalar_lea.hbm %s691_s1, 128 }
  0x12   : > { %p541_p11 = pnand %p292_p10, %p693_p1  ;;  %p342_p0 = scmp.ne.s32.totalorder %s691_s1, %s341_s27 }
  0x13   : > { %s700_s23 = scalar_select %p547_p12, 1, 0 }
  0x14   : > { %p343_p3 = pneg %p541_p11  ;;  %p348_p10 = scmp.lt.u32.totalorder %s341_s27, %s691_s1 }
  0x16   : > { %p344_p5 = pnand %p343_p3, %p342_p0 }
  0x18   : > { %p345_p7 = pneg %p344_p5 }
  0x1a   : > { %p350_p9 = pnand %p348_p10, %p345_p7 }
  0x1c   : > { %353 = shalt.err (!%p350_p9)
}
  0x1d   : > { %s354_s4 = scalar_lea.vmem %s111_s19, 128  ;;  %p362_p6 = scmp.lt.s32.totalorder %s111_s19, %s111_s19 }
  0x1e   : > { %p355_p1 = scmp.ne.s32.totalorder %s111_s19, %s354_s4  ;;  %p363_p4 = scmp.lt.s32.totalorder %s354_s4, %s354_s4 }
  0x20   : > { %p357_p2 = pnand %p355_p1, %p343_p3  ;;  %p364_p8 = por %p363_p4, %p362_p6 }
  0x22   : > { %p358_p13 = pneg %p357_p2 }
  0x24   : > { %p365_p12 = pnand %p364_p8, %p358_p13 }
  0x26   : > { %368 = shalt.err (!%p365_p12)
}
  0x27   : > { %295 = dma.hbm_to_vmem [thread:$0]  (!%p541_p11), %s691_s1, 128, %s111_s19, [#allocation6]  }
  0x28   : > { %p701_p1 = scmp.ne.s32.totalorder %s700_s23, 0  ;;  %p34_p2 = scmp.eq.s32.totalorder %s469_s12, 0 }
  0x29   : > { %p702_p4 = scmp.ne.s32.totalorder %s465_s11, %s461_s10  ;;  %p703_p6 = scmp.eq.s32.totalorder %s510_s13, 1 }
  0x2a   : > { %s573_s7 = scalar_select %p701_p1, %s465_s11, %s26_s24  }
  0x2b   : > { %p581_p8 = por %p703_p6, %p702_p4  ;;  %p305_p9 = scmp.lt.s32.totalorder %s469_s12, 2 }
  0x2c   : > { %s121_s14 = sand.u32 1, %s465_s11   ;;  %p705_p12 = pmov %p702_p4 }
  0x2d   : > { %s274_s18 = sshll.u32 %s121_s14, 3  ;;  %s275_s21 = sshll.u32 %s469_s12, 7 }
  0x2e   : > { %p35_p13 = por %p34_p2, %p705_p12  ;;  %s594_s19 = scalar_lea.hbm %s690_s0, %s275_s21 }
  0x2f   : > { %s125_s23 = scalar_lea.vmem [#allocation2], %s274_s18  ;;  %s122_s27 = scalar_lea.sflag [#allocation3], %s121_s14 }
  0x30   : > { %s132_s24 = sshll.u32 %s125_s23, 4  ;;  %p596_p11 = pnand %p305_p9, %p35_p13  ;;  %s600_s24 = int_to_ptr.vmem [resolvable:$true] %s132_s24 }
  0x31   : > { %s369_s28 = scalar_lea.hbm %s594_s19, 128  ;;  %s374_s3 = scalar_lea.hbm %s690_s0, 256 }
  0x32   : > { %p370_p0 = scmp.ne.s32.totalorder %s594_s19, %s369_s28  ;;  %p371_p3 = pneg %p596_p11 }
  0x33   : > { %p375_p10 = scmp.lt.u32.totalorder %s594_s19, %s690_s0  ;;  %p376_p1 = scmp.lt.u32.totalorder %s374_s3, %s369_s28 }
  0x34   : > { %p372_p5 = pnand %p371_p3, %p370_p0  ;;  %p378_p4 = scmp.lt.u32.totalorder %s369_s28, %s594_s19 }
  0x35   : > { %p377_p2 = por %p376_p1, %p375_p10 }
  0x36   : > { %p373_p7 = pneg %p372_p5 }
  0x37   : > { %p379_p6 = por %p378_p4, %p377_p2 }
  0x39   : > { %p380_p9 = pnand %p379_p6, %p373_p7 }
  0x3b   : > { %383 = shalt.err (!%p380_p9)
}
  0x3c   : > { %s384_s6 = scalar_lea.vmem %s600_s24, 128  ;;  %s472_s14 = smov [#allocation2]  }
  0x3d   : > { %p385_p12 = scmp.ne.s32.totalorder %s600_s24, %s384_s6  ;;  %s389_s18 = sshll.u32 %s472_s14, 4  ;;  %s390_s18 = int_to_ptr.vmem [resolvable:$false] %s389_s18 }
  0x3e   : > { %s391_s21 = scalar_lea.vmem %s390_s18, 256  ;;  %p392_p5 = scmp.lt.s32.totalorder %s600_s24, %s390_s18 }
  0x3f   : > { %p387_p13 = pnand %p385_p12, %p371_p3  ;;  %p393_p10 = scmp.lt.s32.totalorder %s391_s21, %s384_s6 }
  0x41   : > { %p388_p0 = pneg %p387_p13  ;;  %p394_p1 = por %p393_p10, %p392_p5 }
  0x43   : > { %p395_p2 = pnand %p394_p1, %p388_p0 }
  0x45   : > { %398 = shalt.err (!%p395_p2)
}
  0x46   : > { %299 = dma.hbm_to_vmem [thread:$0]  (!%p596_p11), %s594_s19, 128, %s600_s24, %s122_s27  }
  0x47   : > { %p707_p7 = scmp.ne.s32.totalorder %s698_s17, 0 }
  0x48   : > { %s630_s22 = sand.u32 (!%p707_p7), 1, %s461_s10   ;;  %p708_p3 = scmp.ne.s32.totalorder (!%p707_p7), %s696_s15, 0 }
  0x49   : > { %141 = sbr.rel (%p707_p7) target bundleno = 109 (0x6d), region = 28  ;;  %s277_s25 = sshll.u32 (!%p707_p7), %s630_s22, 3 }
  0x4a   : > { %s144_s23 = scalar_lea.sflag (!%p707_p7), [#allocation3], %s630_s22  ;;  %s147_s28 = scalar_lea.vmem (!%p707_p7), [#allocation2], %s277_s25 }
  0x50   : > { %444 = dma.done.wait (%p708_p3), %s144_s23, 128  }
  0x51   : > { %446 = vsyncadd (%p708_p3), %s144_s23, 4294967168  ;;  %p709_p4 = scmp.eq.s32.totalorder %s510_s13, 0 }
  0x53   : > { %448 = dma.done.wait (%p709_p4), [#allocation6], 128   ;;  %p710_p11 = pmov %p709_p4 }
  0x54   : > { %s171_s17 = scalar_lea.vmem [#allocation7], %s277_s25  ;;  %s281_s24 = sshll.u32 %s510_s13, 7  ;;  %v172_v0 = vld [vmem:[%s147_s28] sm:$0xff]  ;;  %v173_v1 = vld [vmem:[#allocation5] sm:$0xff] }
  0x55   : > { %450 = vsyncadd (%p710_p11), [#allocation6], 4294967168  ;;  %s190_s19 = sshll.u32 %s171_s17, 4  ;;  %v174_v2 = vadd.f32 %v173_v1, %v172_v0  ;;  %s648_s27 = scalar_lea.hbm %s692_s2, %s281_s24  ;;  %s643_s19 = int_to_ptr.vmem [resolvable:$true] %s190_s19 }
  0x56   : > { %s177_s29 = scalar_lea.sflag [#allocation4], %s630_s22  ;;  %s399_s30 = scalar_lea.vmem %s643_s19, 128 }
  0x57   : > { %175 = vst [vmem:[%s171_s17] sm:$0xff] %v174_v2  ;;  %p400_p6 = scmp.ne.s32.totalorder %s643_s19, %s399_s30  ;;  %s473_s13 = smov [#allocation7]  }
  0x58   : > { %s403_s3 = sshll.u32 %s473_s13, 4  ;;  %s404_s3 = int_to_ptr.vmem [resolvable:$false] %s403_s3 }
  0x59   : > { %p401_p9 = pnand %p400_p6, %p581_p8  ;;  %s405_s4 = scalar_lea.vmem %s404_s3, 256 }
  0x5a   : > { %p406_p13 = scmp.lt.s32.totalorder %s643_s19, %s404_s3  ;;  %p407_p0 = scmp.lt.s32.totalorder %s405_s4, %s399_s30 }
  0x5b   : > { %p402_p12 = pneg %p401_p9 }
  0x5c   : > { %p408_p5 = por %p407_p0, %p406_p13 }
  0x5e   : > { %p409_p10 = pnand %p408_p5, %p402_p12 }
  0x60   : > { %412 = shalt.err (!%p409_p10)
}
  0x61   : > { %s413_s5 = scalar_lea.hbm %s648_s27, 128  ;;  %s417_s18 = scalar_lea.hbm %s692_s2, 256 }
  0x62   : > { %p414_p1 = scmp.ne.s32.totalorder %s648_s27, %s413_s5  ;;  %p418_p3 = scmp.lt.u32.totalorder %s648_s27, %s692_s2 }
  0x63   : > { %p419_p4 = scmp.lt.u32.totalorder %s417_s18, %s413_s5  ;;  %p421_p6 = scmp.lt.u32.totalorder %s413_s5, %s648_s27 }
  0x64   : > { %p415_p2 = pnand %p414_p1, %p581_p8 }
  0x65   : > { %p420_p11 = por %p419_p4, %p418_p3 }
  0x66   : > { %p416_p7 = pneg %p415_p2 }
  0x67   : > { %p422_p9 = por %p421_p6, %p420_p11 }
  0x69   : > { %p423_p12 = pnand %p422_p9, %p416_p7 }
  0x6b   : > { %426 = shalt.err (!%p423_p12)
}
  0x6c   : > { %290 = dma.vmem_to_hbm [thread:$0]  (%p581_p8), %s643_s19, 128, %s648_s27, %s177_s29  }
  0x6d PF: > { %s202_s25 = sand.u32 1, %s457_s9   ;;  %p711_p13 = scmp.ne.s32.totalorder %s697_s16, 0 }
  0x6e   : > { %p712_p0 = scmp.ge.s32.totalorder %s469_s12, 2  ;;  %s203_s23 = scalar_lea.sflag [#allocation4], %s202_s25 }
  0x70   : > { %p301_p5 = pnand %p712_p0, %p711_p13 }
  0x72   : > { %452 = dma.done.wait (!%p301_p5), %s203_s23, 128  }
  0x73   : > { %454 = vsyncadd (!%p301_p5), %s203_s23, 4294967168  ;;  %p16_p10 = scmp.ge.s32.totalorder %s537_s20, 4   ;;  %s713_s9 = smov %s461_s10 }
  0x74   : > { %s714_s10 = smov %s465_s11  ;;  %s715_s11 = smov %s573_s7 }
  0x75   : > { %s716_s12 = smov %s537_s20  ;;  %18 = sbr.rel (!%p16_p10) target bundleno = 6 (0x6), region = 77 }
  0x7c   :  { %208 = vsyncpa [#allocation3], 1 }
  0x7d   :  { %210 = vsyncpa [#allocation3 + $0x1], 1 }
  0x7e   :  { %211 = vsyncpa [#allocation6], 1 }
  0x7f   :  { %212 = vsyncpa [#allocation4], 1 }
  0x80   :  { %214 = vsyncpa [#allocation4 + $0x1], 1 }

// kernel: _species_forward.1
= control target key start
LH: loop header
LB: loop body
LE: loop exit
PB: predicated region body
PF: predicated region fallthrough
CT: control target
= control target key end

     0   :  { %v260_v0 = vmov 0.0   ;;  %vm261_vm0 = vmmov 0   ;;  %vm37_vm1 = vcmask 130048   ;;  %s331_s1 = inlined_call_operand.vmem [shape: bf16[16,128], index: 1, kind: input, shape index: {}]   ;;  %s332_s0 = inlined_call_operand.vmem [shape: bf16[4,16], index: 0, kind: input, shape index: {}]   ;;  %s333_s3 = inlined_call_operand.vmem [shape: bf16[128,128], index: 3, kind: input, shape index: {}]   ;;  %s334_s2 = inlined_call_operand.vmem [shape: f32[1,128], index: 2, kind: input, shape index: {}]   ;;  %s335_s4 = inlined_call_operand.vmem [shape: f32[1,128], index: 4, kind: input, shape index: {}]   ;;  %s336_s5 = inlined_call_operand.vmem [shape: f32[4,128], index: 5, kind: output, shape index: {}]  }
   0x1   :  { %223 = vmatprep.subr.bf16.mxu0 %v260_v0  ;;  %v251_v1 = vld [vmem:[%s331_s1] sm:$0xff]   ;;  %225 = vmatprep.mubr.msk.bf16.mxu0 %vm261_vm0, %v260_v0  ;;  %v253_v4 = vld [vmem:[%s333_s3 + $0x8] sm:$0xff]   ;;  %v254_v5 = vld [vmem:[%s333_s3 + $0x10] sm:$0xff]  }
   0x2   :  { %v21_v2 = vld [vmem:[%s332_s0] sm:$0x3]  ;;  %229 = vmatprep.subr.bf16.mxu1 %v260_v0  ;;  %245 = vmatprep.mubr.msk.bf16.mxu1 %vm261_vm0, %v260_v0  ;;  %v255_v6 = vld [vmem:[%s333_s3 + $0x18] sm:$0xff]   ;;  %v257_v8 = vld [vmem:[%s333_s3 + $0x28] sm:$0xff]  }
   0x3   :  { %224 = vmatpush3.bf16.msra.mxu0 %v251_v1  ;;  %v252_v3 = vld [vmem:[%s333_s3] sm:$0xff]   ;;  %v258_v9 = vld [vmem:[%s333_s3 + $0x30] sm:$0xff]   ;;  %v259_v10 = vld [vmem:[%s333_s3 + $0x38] sm:$0xff]  }
   0x4   :  { %230 = vmatpush3.bf16.msra.mxu1 %v252_v3  ;;  %v256_v7 = vld [vmem:[%s333_s3 + $0x20] sm:$0xff]  }
   0x5   :  { %231 = vmatprep.subr.bf16.mxu1 %v260_v0  ;;  %v200_v11 = vld [vmem:[%s334_s2] ss:$0 sm:$0xff] }
   0x6   :  { %226 = vmatmul.mubr.msk.bf16.vlgmr.msra.gmra.mrb[0].mxu0 %vm37_vm1, %v21_v2  ;;  %v203_v19 = vld [vmem:[%s335_s4] ss:$0 sm:$0xff] }
   0x8   :  { %232 = vmatpush3.bf16.msra.mxu1 %v253_v4 }
   0x9   :  { %233 = vmatprep.subr.bf16.mxu1 %v260_v0 }
   0xc   :  { %234 = vmatpush3.bf16.msra.mxu1 %v254_v5 }
   0xd   :  { %235 = vmatprep.subr.bf16.mxu1 %v260_v0 }
  0x10   :  { %236 = vmatpush3.bf16.msra.mxu1 %v255_v6 }
  0x11   :  { %237 = vmatprep.subr.bf16.mxu1 %v260_v0 }
  0x14   :  { %238 = vmatpush3.bf16.msra.mxu1 %v256_v7 }
  0x15   :  { %239 = vmatprep.subr.bf16.mxu1 %v260_v0 }
  0x18   :  { %240 = vmatpush3.bf16.msra.mxu1 %v257_v8 }
  0x19   :  { %241 = vmatprep.subr.bf16.mxu1 %v260_v0 }
  0x1c   :  { %242 = vmatpush3.bf16.msra.mxu1 %v258_v9 }
  0x1d   :  { %243 = vmatprep.subr.bf16.mxu1 %v260_v0 }
  0x20   :  { %244 = vmatpush3.bf16.msra.mxu1 %v259_v10 }
  0xd9   :  { %v75_v12 = vpop.f32.mrb[0].mxu0 }
  0xda   :  { %v76_v13 = vadd.f32 %v200_v11, %v75_v12  ;;  %v227_v14 = vpop.f32.mrb[1].mxu0 }
  0xdb   :  { %v78_v15 = vpop.f32.mrb[2].mxu0 }
  0xdc   :  { %v81_v16 = vmax.f32 %v76_v13, 0.0  ;;  %v228_v17 = vpop.f32.mrb[3].mxu0 }
  0xde   :  { %v82_v18 = vpack.c.bf16 %v81_v16, %v81_v16 }
  0xe0   :  { %246 = vmatmul.mubr.bf16.vlgmr.msra.gmra.mrb[0].mxu1 %v82_v18 }
 0x1b3   :  { %v188_v20 = vpop.f32.mrb[0].mxu1 }
 0x1b4   :  { %v189_v21 = vadd.f32 %v203_v19, %v188_v20  ;;  %v247_v22 = vpop.f32.mrb[1].mxu1 }
 0x1b5   :  { %v191_v23 = vpop.f32.mrb[2].mxu1 }
 0x1b6   :  { %v194_v24 = vmax.f32 %v189_v21, 0.0  ;;  %v248_v25 = vpop.f32.mrb[3].mxu1 }
 0x1b8   :  { %195 = vst [vmem:[%s336_s5] sm:$0xf] %v194_v24 }

</bundles_post_ra>
